<compile_context>
chip_gen: v5e
topology: v5e:2x2
jax: 0.10.0
libtpu: 0.0.40
codegen_flags: <defaults>
</compile_context>

<pallas_src>
import math
import jax
import jax.numpy as jnp
from jax.experimental import pallas as pl
from jax.experimental.pallas import tpu as pltpu


def _tokenizer_kernel(x_ref, e_ref, w_ref, w2_ref, b_ref, b2_ref, o_ref):
    # x_ref : (tb, D)      block of numerical features
    # e_ref : (D, D*T)     one-hot expansion matrix, E[d, d*T + t] = 1
    # w_ref, w2_ref, b_ref, b2_ref : (1, D*T)  flattened parameters
    # o_ref : (tb, D*T)    lane-dense output block
    # x_flat[i, d*T + t] = x[i, d]  via MXU (MXU is otherwise idle here).
    x_flat = jnp.dot(x_ref[...], e_ref[...], preferred_element_type=jnp.float32)
    w = w_ref[...]
    w2 = w2_ref[...]
    b = b_ref[...]
    b2 = b2_ref[...]
    x1 = w * x_flat + b
    x2 = w2 * x_flat + b2
    o_ref[...] = (x1 * jnp.tanh(x2)).astype(o_ref.dtype)


def _round_up(x, m):
    return ((x + m - 1) // m) * m


def tokenizer_forward(x_num, weight, weight2, bias, bias2, *, tb=None, out_dtype=None):
    """Pallas implementation of Tokenizer.forward (categories=None case)."""
    B, D = x_num.shape
    D_w, T = weight.shape
    assert D_w == D and weight2.shape == (D, T)
    assert bias.shape == (D, T) and bias2.shape == (D, T)
    DT = D * T

    if out_dtype is None:
        out_dtype = x_num.dtype
    out_itemsize = jnp.dtype(out_dtype).itemsize

    # ---- pick a batch tile: multiple of 8 rows, ~1 MiB output block --------
    if tb is None:
        tb = max(8, ((1 << 20) // (DT * out_itemsize)) // 8 * 8)
        # If the whole batch would fit in one block but is big enough to split,
        # use >=2 blocks so DMA/compute overlap and v7x can use both TCs.
        if tb >= B and B > 16:
            tb = max(8, (_round_up(B, 16) // 2) // 8 * 8)
        tb = min(tb, _round_up(B, 8))
    assert tb % 8 == 0

    num_blocks = pl.cdiv(B, tb)
    B_pad = num_blocks * tb
    x_p = x_num if B_pad == B else jnp.pad(x_num, ((0, B_pad - B), (0, 0)))

    # ---- flatten parameters to lane-dense (1, D*T) rows ---------------------
    w_flat = weight.reshape(1, DT)
    w2_flat = weight2.reshape(1, DT)
    b_flat = bias.reshape(1, DT)
    b2_flat = bias2.reshape(1, DT)

    # One-hot expansion matrix E[d, d*T + t] = 1 (tiny, constant-folded).
    expand = jnp.repeat(jnp.eye(D, dtype=x_num.dtype), T, axis=1)  # (D, DT)

    param_spec = pl.BlockSpec((1, DT), lambda i: (0, 0))

    cost = pl.CostEstimate(
        flops=5 * B_pad * DT + 2 * B_pad * D * DT,
        transcendentals=B_pad * DT,
        bytes_accessed=(x_p.size * x_p.dtype.itemsize
                        + 5 * D * DT * 4
                        + B_pad * DT * out_itemsize),
    )

    out2d = pl.pallas_call(
        _tokenizer_kernel,
        out_shape=jax.ShapeDtypeStruct((B_pad, DT), out_dtype),
        grid_spec=pltpu.PrefetchScalarGridSpec(
            num_scalar_prefetch=0,
            grid=(num_blocks,),
            in_specs=[
                pl.BlockSpec((tb, D), lambda i: (i, 0)),   # x block
                pl.BlockSpec((D, DT), lambda i: (0, 0)),   # expansion matrix
                param_spec,                                 # weight
                param_spec,                                 # weight2
                param_spec,                                 # bias
                param_spec,                                 # bias2
            ],
            out_specs=pl.BlockSpec((tb, DT), lambda i: (i, 0)),
        ),
        compiler_params=pltpu.CompilerParams(
            dimension_semantics=("parallel",),
            vmem_limit_bytes=32 * 1024 * 1024,   # safe on v5e/v6e/v7x
        ),
        cost_estimate=cost,
    )(x_p, expand, w_flat, w2_flat, b_flat, b2_flat)

    out2d = out2d[:B] if B_pad != B else out2d
    return out2d.reshape(B, D, T)


# -------------------- deterministic parameter init (mirrors PyTorch) --------------------
def attenuated_kaiming_uniform(key, shape, a=math.sqrt(5), scale=1.0):
    # fan_in for a 2-D (d_numerical, d_token) tensor is d_token
    fan_in = shape[1]
    gain = math.sqrt(2.0 / (1.0 + a * a))          # leaky_relu gain
    std = gain * scale / math.sqrt(fan_in)
    bound = math.sqrt(3.0) * std
    return jax.random.uniform(key, shape, jnp.float32, minval=-bound, maxval=bound)


def kaiming_uniform(key, shape, a=math.sqrt(5)):
    fan_in = shape[1]
    gain = math.sqrt(2.0 / (1.0 + a * a))
    std = gain / math.sqrt(fan_in)
    bound = math.sqrt(3.0) * std
    return jax.random.uniform(key, shape, jnp.float32, minval=-bound, maxval=bound)


def tokenizer_reference(x_num, weight, weight2, bias, bias2):
    x1 = weight[None] * x_num[:, :, None] + bias[None]
    x2 = weight2[None] * x_num[:, :, None] + bias2[None]
    return x1 * jnp.tanh(x2)


# TODO(synk): categorical path (categories is not None -> embedding lookup) is not
# exercised by this forward and is not implemented here.

if __name__ == "__main__":
    # Small shapes consistent with the module: batch=8, d_numerical=4, d_token=32.
    B, D_NUM, D_TOKEN = 8, 4, 32
    key = jax.random.PRNGKey(0)
    k_x, k_w, k_w2, k_b, k_b2 = jax.random.split(key, 5)

    x_num = jax.random.normal(k_x, (B, D_NUM), jnp.float32)
    weight = attenuated_kaiming_uniform(k_w, (D_NUM, D_TOKEN))
    weight2 = attenuated_kaiming_uniform(k_w2, (D_NUM, D_TOKEN))
    bias = kaiming_uniform(k_b, (D_NUM, D_TOKEN))
    bias2 = kaiming_uniform(k_b2, (D_NUM, D_TOKEN))

    out = tokenizer_forward(x_num, weight, weight2, bias, bias2)
    out = jax.block_until_ready(out)

    ref = tokenizer_reference(x_num, weight, weight2, bias, bias2)
    assert out.shape == (B, D_NUM, D_TOKEN)
    assert jnp.allclose(out, ref, atol=1e-5, rtol=1e-5), "mismatch vs reference"

    # Also exercise a non-divisible, multi-block batch to check padding path.
    B2 = 100
    x2 = jax.random.normal(jax.random.PRNGKey(1), (B2, D_NUM), jnp.float32)
    out2 = jax.block_until_ready(tokenizer_forward(x2, weight, weight2, bias, bias2))
    ref2 = tokenizer_reference(x2, weight, weight2, bias, bias2)
    assert out2.shape == (B2, D_NUM, D_TOKEN)
    assert jnp.allclose(out2, ref2, atol=1e-5, rtol=1e-5), "mismatch vs reference (padded)"

    print("KERNEL_OK")
</pallas_src>

<mosaic_0001>
module attributes {stable_mosaic.version = 11 : i64} {
  func.func @_tokenizer_kernel(%arg0: i32, %arg1: memref<8x4xf32, #tpu.memory_space<vmem>>, %arg2: memref<4x128xf32, #tpu.memory_space<vmem>>, %arg3: memref<1x128xf32, #tpu.memory_space<vmem>>, %arg4: memref<1x128xf32, #tpu.memory_space<vmem>>, %arg5: memref<1x128xf32, #tpu.memory_space<vmem>>, %arg6: memref<1x128xf32, #tpu.memory_space<vmem>>, %arg7: memref<8x128xf32, #tpu.memory_space<vmem>>) attributes {dimension_semantics = [#tpu.dimension_semantics<parallel>], iteration_bounds = array<i64: 1>, scalar_prefetch = 0 : i64, scratch_operands = 0 : i64, tpu.core_type = #tpu.core_type<tc>, window_params = [{transform_indices = @transform_0, window_bounds = array<i64: 8, 4>}, {pipeline_mode = #tpu.pipeline_mode<synchronous>, transform_indices = @transform_1, window_bounds = array<i64: 4, 128>}, {pipeline_mode = #tpu.pipeline_mode<synchronous>, transform_indices = @transform_2, window_bounds = array<i64: 1, 128>}, {pipeline_mode = #tpu.pipeline_mode<synchronous>, transform_indices = @transform_3, window_bounds = array<i64: 1, 128>}, {pipeline_mode = #tpu.pipeline_mode<synchronous>, transform_indices = @transform_4, window_bounds = array<i64: 1, 128>}, {pipeline_mode = #tpu.pipeline_mode<synchronous>, transform_indices = @transform_5, window_bounds = array<i64: 1, 128>}, {transform_indices = @transform_6, window_bounds = array<i64: 8, 128>}]} {
    %c0 = arith.constant 0 : index
    %c0_0 = arith.constant 0 : index
    %0 = vector.load %arg1[%c0, %c0_0] : memref<8x4xf32, #tpu.memory_space<vmem>>, vector<8x4xf32>
    %c0_1 = arith.constant 0 : index
    %c0_2 = arith.constant 0 : index
    %1 = vector.load %arg2[%c0_1, %c0_2] : memref<4x128xf32, #tpu.memory_space<vmem>>, vector<4x128xf32>
    %cst = arith.constant dense<0.000000e+00> : vector<8x128xf32>
    %2 = tpu.matmul %0, %1, %cst {dimension_numbers = #tpu.dot_dimension_numbers<[1], [0], [0], [1], [0, 0, 1, 1], [], []>} : vector<8x4xf32>, vector<4x128xf32>, vector<8x128xf32> -> vector<8x128xf32>
    %c0_3 = arith.constant 0 : index
    %c0_4 = arith.constant 0 : index
    %3 = vector.load %arg3[%c0_3, %c0_4] : memref<1x128xf32, #tpu.memory_space<vmem>>, vector<1x128xf32>
    %c0_5 = arith.constant 0 : index
    %c0_6 = arith.constant 0 : index
    %4 = vector.load %arg4[%c0_5, %c0_6] : memref<1x128xf32, #tpu.memory_space<vmem>>, vector<1x128xf32>
    %c0_7 = arith.constant 0 : index
    %c0_8 = arith.constant 0 : index
    %5 = vector.load %arg5[%c0_7, %c0_8] : memref<1x128xf32, #tpu.memory_space<vmem>>, vector<1x128xf32>
    %c0_9 = arith.constant 0 : index
    %c0_10 = arith.constant 0 : index
    %6 = vector.load %arg6[%c0_9, %c0_10] : memref<1x128xf32, #tpu.memory_space<vmem>>, vector<1x128xf32>
    %7 = vector.broadcast %3 : vector<1x128xf32> to vector<8x128xf32>
    %8 = arith.mulf %7, %2 : vector<8x128xf32>
    %9 = vector.broadcast %5 : vector<1x128xf32> to vector<8x128xf32>
    %10 = arith.addf %8, %9 : vector<8x128xf32>
    %11 = vector.broadcast %4 : vector<1x128xf32> to vector<8x128xf32>
    %12 = arith.mulf %11, %2 : vector<8x128xf32>
    %13 = vector.broadcast %6 : vector<1x128xf32> to vector<8x128xf32>
    %14 = arith.addf %12, %13 : vector<8x128xf32>
    %15 = math.tanh %14 : vector<8x128xf32>
    %16 = arith.mulf %10, %15 : vector<8x128xf32>
    %c0_11 = arith.constant 0 : index
    %c0_12 = arith.constant 0 : index
    %17 = vector.load %arg7[%c0_11, %c0_12] : memref<8x128xf32, #tpu.memory_space<vmem>>, vector<8x128xf32>
    tpu.vector_store %arg7[%c0_11, %c0_12], %16 {strides = array<i32>} : memref<8x128xf32, #tpu.memory_space<vmem>>, vector<8x128xf32>,
    return
  }
  func.func @transform_0(%arg0: i32) -> (i32, i32) {
    %c0_i32 = arith.constant 0 : i32
    %c0_i32_0 = arith.constant 0 : i32
    return %arg0, %c0_i32 : i32, i32
  }
  func.func @transform_1(%arg0: i32) -> (i32, i32) {
    %c0_i32 = arith.constant 0 : i32
    %c0_i32_0 = arith.constant 0 : i32
    %c0_i32_1 = arith.constant 0 : i32
    return %c0_i32, %c0_i32_0 : i32, i32
  }
  func.func @transform_2(%arg0: i32) -> (i32, i32) {
    %c0_i32 = arith.constant 0 : i32
    %c0_i32_0 = arith.constant 0 : i32
    %c0_i32_1 = arith.constant 0 : i32
    return %c0_i32, %c0_i32_0 : i32, i32
  }
  func.func @transform_3(%arg0: i32) -> (i32, i32) {
    %c0_i32 = arith.constant 0 : i32
    %c0_i32_0 = arith.constant 0 : i32
    %c0_i32_1 = arith.constant 0 : i32
    return %c0_i32, %c0_i32_0 : i32, i32
  }
  func.func @transform_4(%arg0: i32) -> (i32, i32) {
    %c0_i32 = arith.constant 0 : i32
    %c0_i32_0 = arith.constant 0 : i32
    %c0_i32_1 = arith.constant 0 : i32
    return %c0_i32, %c0_i32_0 : i32, i32
  }
  func.func @transform_5(%arg0: i32) -> (i32, i32) {
    %c0_i32 = arith.constant 0 : i32
    %c0_i32_0 = arith.constant 0 : i32
    %c0_i32_1 = arith.constant 0 : i32
    return %c0_i32, %c0_i32_0 : i32, i32
  }
  func.func @transform_6(%arg0: i32) -> (i32, i32) {
    %c0_i32 = arith.constant 0 : i32
    %c0_i32_0 = arith.constant 0 : i32
    return %arg0, %c0_i32 : i32, i32
  }
}

</mosaic_0001>

<bundles_post_ra>
// kernel: tpu_custom_call.1
= control target key start
LH: loop header
LB: loop body
LE: loop exit
PB: predicated region body
PF: predicated region fallthrough
CT: control target
= control target key end

     0   :  { %vm30_vm0 = vcmask 1043456   ;;  %vm26_vm1 = vcmask 31744   ;;  %s185_s0 = inlined_call_operand.vmem [shape: f32[8,4], index: 0, kind: input, shape index: {}]   ;;  %s186_s1 = inlined_call_operand.vmem [shape: f32[4,128], index: 1, kind: input, shape index: {}]   ;;  %s187_s2 = inlined_call_operand.vmem [shape: f32[1,128], index: 2, kind: input, shape index: {}]   ;;  %s188_s3 = inlined_call_operand.vmem [shape: f32[1,128], index: 3, kind: input, shape index: {}]   ;;  %s189_s4 = inlined_call_operand.vmem [shape: f32[1,128], index: 4, kind: input, shape index: {}]   ;;  %s190_s5 = inlined_call_operand.vmem [shape: f32[1,128], index: 5, kind: input, shape index: {}]   ;;  %s191_s6 = inlined_call_operand.hbm [shape: f32[8,128], index: 6, kind: output, shape index: {}]  }
   0x1   :  { %v25_v0 = vld [vmem:[%s186_s1] sm:$0xf] }
   0x2   :  { %v24_v1 = vld [vmem:[%s185_s0] sm:$0xff]  ;;  %93 = vmatpush.msk.msra.mxu0 %vm30_vm0, %v25_v0 }
   0x3   :  { %94 = vmatmul.msk.f32.vlgmr.msra.gmra.mxu0 %vm26_vm1, %v24_v1 }
   0x4   :  { %11 = vsyncpa [#allocation3], 0  ;;  %v98_v2 = vld [vmem:[%s188_s3] ss:$0 sm:$0xff]  ;;  %s128_s7 = smov [#allocation2]   ;;  %s84_s10 = sshll.u32 %s191_s6, 4  ;;  %s85_s10 = int_to_ptr.hbm [resolvable:$true] %s84_s10 }
   0x5   :  { %v99_v3 = vld [vmem:[%s190_s5] ss:$0 sm:$0xff]  ;;  %s82_s8 = sshll.u32 %s128_s7, 4  ;;  %s83_s8 = int_to_ptr.vmem [resolvable:$true] %s82_s8 }
   0x6   :  { %v96_v6 = vld [vmem:[%s187_s2] ss:$0 sm:$0xff] }
   0x7   :  { %v97_v9 = vld [vmem:[%s189_s4] ss:$0 sm:$0xff] }
  0x80   :  { %v51_v4 = vpop.f32.mrf.mxu0 }
  0x81   :  { %v69_v5 = vmul.f32 %v98_v2, %v51_v4  ;;  %v61_v8 = vmul.f32 %v96_v6, %v51_v4 }
  0x83   :  { %v73_v7 = vadd.f32 %v99_v3, %v69_v5  ;;  %v65_v10 = vadd.f32 %v97_v9, %v61_v8 }
  0x85   :  { %100 = vtanh.f32 %v73_v7 }
  0x8b   :  { %v101_v11 = vpop.eup %100 }
  0x8c   :  { %v75_v12 = vmul.f32 %v101_v11, %v65_v10 }
  0x8e   :  { %76 = vst [vmem:[#allocation2] sm:$0xff] %v75_v12 }
  0x8f   :  { %87 = dma.vmem_to_hbm [thread:$0]  %s83_s8, 128, %s85_s10, [#allocation3]  }
  0x90   :  { %126 = dma.done.wait [#allocation3], 128  }
  0x91   :  { %127 = vsyncadd [#allocation3], 4294967168 }
  0x92   :  { %92 = vsyncpa [#allocation3], 1 }

</bundles_post_ra>
